<compile_context>
chip_gen: v6e
topology: v6e:2x2x1
jax: 0.10.0
libtpu: 0.0.40
codegen_flags: <defaults>
</compile_context>

<pallas_src>
import jax
import jax.numpy as jnp
from jax.experimental import pallas as pl
from jax.experimental.pallas import tpu as pltpu


def _fused_linear_kernel(x_ref, wc_ref, b_ref, o_ref):
    # o = x @ (w0.T @ w1.T) + b1  ==  F.linear(F.linear(x, w0, None), w1, b1)
    o = jnp.dot(x_ref[...], wc_ref[...], preferred_element_type=jnp.float32)
    o_ref[...] = o + b_ref[...]           # (1, out_pad) bias broadcasts over rows


def _round_up(n, m):
    return (n + m - 1) // m * m


def _choose_tm(rows8, max_block_rows=1024):
    # Single block for small batches; once rows are large enough, keep at least
    # two row blocks so dimension_semantics=("parallel",) can use both v7x TCs,
    # while still allowing large tiles to amortize per-grid-step overhead.
    if rows8 <= 256:
        return rows8
    half = _round_up(-(-rows8 // 2), 8)
    return min(max_block_rows, half)


def _fused_two_layer_2d(x2d, w0, w1, b1):
    rows, in_f = x2d.shape
    out_f = w1.shape[0]

    # ---- one-time (per jitted call) weight fusion + padding ----
    # w0: [hid, in_f], w1: [out_f, hid]  ->  w_comb: [in_f, out_f]
    w_comb = jnp.dot(jnp.transpose(w0), jnp.transpose(w1),
                     preferred_element_type=jnp.float32)

    # Lane-dense output: pad out_f to a multiple of 128 -> unmasked full-vreg
    # stores.  Padded columns are exactly zero (zero weights, zero bias).
    out_pad = _round_up(out_f, 128)
    if out_pad != out_f:
        w_comb = jnp.pad(w_comb, ((0, 0), (0, out_pad - out_f)))
        b1p = jnp.pad(b1, (0, out_pad - out_f)).reshape(1, out_pad)
    else:
        b1p = b1.reshape(1, out_pad)

    # ---- row tiling ----
    rows8 = _round_up(rows, 8)
    tm = _choose_tm(rows8)
    rows_pad = _round_up(rows8, tm)
    if rows_pad != rows:
        x2d = jnp.pad(x2d, ((0, rows_pad - rows), (0, 0)))

    grid = (rows_pad // tm,)

    out = pl.pallas_call(
        _fused_linear_kernel,
        out_shape=jax.ShapeDtypeStruct((rows_pad, out_pad), jnp.float32),
        grid=grid,
        in_specs=[
            pl.BlockSpec((tm, in_f), lambda i: (i, 0)),       # activations: row-tiled
            pl.BlockSpec((in_f, out_pad), lambda i: (0, 0)),  # fused weight: resident
            pl.BlockSpec((1, out_pad), lambda i: (0, 0)),     # bias: resident
        ],
        out_specs=pl.BlockSpec((tm, out_pad), lambda i: (i, 0)),
        compiler_params=pltpu.CompilerParams(
            dimension_semantics=("parallel",)),
    )(x2d, w_comb, b1p)

    return out[:rows, :out_f]


@jax.jit
def model_forward(x, y, z, w0, w1, b1):
    """Mirrors Model.forward: two chained F.linear per input, returns (x, y, z).

    All three inputs are flattened to row slabs, concatenated, and pushed through
    ONE pallas_call (single launch, single weight DMA); outputs are split back.
    Everything (weight fusion, concat, slicing) fuses under jit.
    """
    out_f = w1.shape[0]
    inputs = (x, y, z)
    slabs = [t.reshape(-1, t.shape[-1]) for t in inputs]
    row_counts = [s.shape[0] for s in slabs]
    fused = jnp.concatenate(slabs, axis=0)

    fused_out = _fused_two_layer_2d(fused, w0, w1, b1)

    outs = []
    off = 0
    for t, n in zip(inputs, row_counts):
        outs.append(fused_out[off:off + n].reshape(*t.shape[:-1], out_f))
        off += n
    return tuple(outs)


if __name__ == "__main__":
    key = jax.random.PRNGKey(0)
    k1, k2, k3, k4, k5, k6 = jax.random.split(key, 6)

    in_f, hid, out_f = 64, 32, 16
    x = jax.random.normal(k1, (8, in_f), dtype=jnp.float32)          # 2-D input
    y = jax.random.normal(k2, (2, 8, in_f), dtype=jnp.float32)       # 3-D input
    z = jax.random.normal(k3, (2, 3, 8, in_f), dtype=jnp.float32)    # 4-D input
    w0 = jax.random.normal(k4, (hid, in_f), dtype=jnp.float32) * 0.1
    w1 = jax.random.normal(k5, (out_f, hid), dtype=jnp.float32) * 0.1
    b1 = jax.random.normal(k6, (out_f,), dtype=jnp.float32)

    ox, oy, oz = jax.block_until_ready(model_forward(x, y, z, w0, w1, b1))

    # pure-JAX reference check (two explicit F.linear applications)
    def ref(t):
        h = jnp.einsum("...i,hi->...h", t, w0)
        return jnp.einsum("...h,oh->...o", h, w1) + b1

    assert ox.shape == (8, out_f)
    assert oy.shape == (2, 8, out_f)
    assert oz.shape == (2, 3, 8, out_f)
    assert jnp.allclose(ox, ref(x), atol=1e-4)
    assert jnp.allclose(oy, ref(y), atol=1e-4)
    assert jnp.allclose(oz, ref(z), atol=1e-4)

    print("KERNEL_OK")
</pallas_src>

<mosaic_0001>
module attributes {stable_mosaic.version = 11 : i64} {
  func.func @_fused_linear_kernel(%arg0: i32, %arg1: memref<72x64xf32, #tpu.memory_space<vmem>>, %arg2: memref<64x128xf32, #tpu.memory_space<vmem>>, %arg3: memref<1x128xf32, #tpu.memory_space<vmem>>, %arg4: memref<72x128xf32, #tpu.memory_space<vmem>>) attributes {dimension_semantics = [#tpu.dimension_semantics<parallel>], iteration_bounds = array<i64: 1>, scalar_prefetch = 0 : i64, scratch_operands = 0 : i64, tpu.core_type = #tpu.core_type<tc>, window_params = [{transform_indices = @transform_0, window_bounds = array<i64: 72, 64>}, {pipeline_mode = #tpu.pipeline_mode<synchronous>, transform_indices = @transform_1, window_bounds = array<i64: 64, 128>}, {pipeline_mode = #tpu.pipeline_mode<synchronous>, transform_indices = @transform_2, window_bounds = array<i64: 1, 128>}, {transform_indices = @transform_3, window_bounds = array<i64: 72, 128>}]} {
    %c0 = arith.constant 0 : index
    %c0_0 = arith.constant 0 : index
    %0 = vector.load %arg1[%c0, %c0_0] : memref<72x64xf32, #tpu.memory_space<vmem>>, vector<72x64xf32>
    %c0_1 = arith.constant 0 : index
    %c0_2 = arith.constant 0 : index
    %1 = vector.load %arg2[%c0_1, %c0_2] : memref<64x128xf32, #tpu.memory_space<vmem>>, vector<64x128xf32>
    %cst = arith.constant dense<0.000000e+00> : vector<72x128xf32>
    %2 = tpu.matmul %0, %1, %cst {dimension_numbers = #tpu.dot_dimension_numbers<[1], [0], [0], [1], [0, 0, 1, 1], [], []>} : vector<72x64xf32>, vector<64x128xf32>, vector<72x128xf32> -> vector<72x128xf32>
    %c0_3 = arith.constant 0 : index
    %c0_4 = arith.constant 0 : index
    %3 = vector.load %arg3[%c0_3, %c0_4] : memref<1x128xf32, #tpu.memory_space<vmem>>, vector<1x128xf32>
    %4 = vector.broadcast %3 : vector<1x128xf32> to vector<72x128xf32>
    %5 = arith.addf %2, %4 : vector<72x128xf32>
    %c0_5 = arith.constant 0 : index
    %c0_6 = arith.constant 0 : index
    %6 = vector.load %arg4[%c0_5, %c0_6] : memref<72x128xf32, #tpu.memory_space<vmem>>, vector<72x128xf32>
    tpu.vector_store %arg4[%c0_5, %c0_6], %5 {strides = array<i32>} : memref<72x128xf32, #tpu.memory_space<vmem>>, vector<72x128xf32>,
    return
  }
  func.func @transform_0(%arg0: i32) -> (i32, i32) {
    %c0_i32 = arith.constant 0 : i32
    %c0_i32_0 = arith.constant 0 : i32
    return %arg0, %c0_i32 : i32, i32
  }
  func.func @transform_1(%arg0: i32) -> (i32, i32) {
    %c0_i32 = arith.constant 0 : i32
    %c0_i32_0 = arith.constant 0 : i32
    %c0_i32_1 = arith.constant 0 : i32
    return %c0_i32, %c0_i32_0 : i32, i32
  }
  func.func @transform_2(%arg0: i32) -> (i32, i32) {
    %c0_i32 = arith.constant 0 : i32
    %c0_i32_0 = arith.constant 0 : i32
    %c0_i32_1 = arith.constant 0 : i32
    return %c0_i32, %c0_i32_0 : i32, i32
  }
  func.func @transform_3(%arg0: i32) -> (i32, i32) {
    %c0_i32 = arith.constant 0 : i32
    %c0_i32_0 = arith.constant 0 : i32
    return %arg0, %c0_i32 : i32, i32
  }
}

</mosaic_0001>

<bundles_post_ra>
// kernel: model_forward.1
= control target key start
LH: loop header
LB: loop body
LE: loop exit
PB: predicated region body
PF: predicated region fallthrough
CT: control target
= control target key end

     0   :  { %v277_v0 = vmov 0.0   ;;  %vm38_vm0 = vcmask 523264   ;;  %vm278_vm1 = vmmov 0   ;;  %s423_s1 = inlined_call_operand.vmem [shape: f32[64,128], index: 1, kind: input, shape index: {}]   ;;  %s424_s0 = inlined_call_operand.vmem [shape: f32[72,64], index: 0, kind: input, shape index: {}]   ;;  %s425_s2 = inlined_call_operand.vmem [shape: f32[1,128], index: 2, kind: input, shape index: {}]   ;;  %s426_s3 = inlined_call_operand.vmem [shape: f32[72,128], index: 3, kind: output, shape index: {}]  }
   0x1   :  { %216 = vmatprep.subr.mxu0 %v277_v0  ;;  %v30_v1 = vld [vmem:[%s423_s1 + $0x38] sm:$0xff]  ;;  %259 = vmatprep.subr.mxu1 %v277_v0  ;;  %v29_v2 = vld [vmem:[%s423_s1 + $0x30] sm:$0xff]  ;;  %v28_v3 = vld [vmem:[%s423_s1 + $0x28] sm:$0xff] }
   0x2   :  { %217 = vmatpush3.msra.mxu0 %v30_v1  ;;  %267 = vmatpush3.msra.mxu1 %v30_v1  ;;  %v27_v4 = vld [vmem:[%s423_s1 + $0x20] sm:$0xff]  ;;  %v26_v5 = vld [vmem:[%s423_s1 + $0x18] sm:$0xff]  ;;  %v25_v6 = vld [vmem:[%s423_s1 + $0x10] sm:$0xff] }
   0x3   :  { %218 = vmatprep.subr.mxu0 %v277_v0  ;;  %260 = vmatprep.subr.mxu1 %v277_v0  ;;  %v24_v7 = vld [vmem:[%s423_s1 + $0x8] sm:$0xff]  ;;  %v23_v8 = vld [vmem:[%s423_s1] sm:$0xff]  ;;  %v20_v12 = vld [vmem:[%s424_s0 + $0x30] sm:$0xff] }
   0x4   :  { %219 = vmatpush3.msra.mxu0 %v29_v2  ;;  %268 = vmatpush3.msra.mxu1 %v29_v2  ;;  %v14_v9 = vld [vmem:[%s424_s0] sm:$0xff]  ;;  %v19_v10 = vld [vmem:[%s424_s0 + $0x28] sm:$0xff]  ;;  %v16_v13 = vld [vmem:[%s424_s0 + $0x10] sm:$0xff] }
   0x5   :  { %220 = vmatprep.subr.mxu0 %v277_v0  ;;  %261 = vmatprep.subr.mxu1 %v277_v0  ;;  %v15_v11 = vld [vmem:[%s424_s0 + $0x8] sm:$0xff]  ;;  %v21_v14 = vld [vmem:[%s424_s0 + $0x38] sm:$0xff]  ;;  %v22_v16 = vld [vmem:[%s424_s0 + $0x40] sm:$0xff] }
   0x6   :  { %221 = vmatpush3.msra.mxu0 %v28_v3  ;;  %269 = vmatpush3.msra.mxu1 %v28_v3  ;;  %v17_v15 = vld [vmem:[%s424_s0 + $0x18] sm:$0xff]  ;;  %v18_v17 = vld [vmem:[%s424_s0 + $0x20] sm:$0xff] }
   0x7   :  { %222 = vmatprep.subr.mxu0 %v277_v0  ;;  %262 = vmatprep.subr.mxu1 %v277_v0  ;;  %v189_v18 = vld [vmem:[%s425_s2] ss:$0 sm:$0xff] }
   0x8   :  { %223 = vmatpush3.msra.mxu0 %v27_v4  ;;  %270 = vmatpush3.msra.mxu1 %v27_v4 }
   0x9   :  { %224 = vmatprep.subr.mxu0 %v277_v0  ;;  %263 = vmatprep.subr.mxu1 %v277_v0 }
   0xa   :  { %225 = vmatpush3.msra.mxu0 %v26_v5  ;;  %271 = vmatpush3.msra.mxu1 %v26_v5 }
   0xb   :  { %226 = vmatprep.subr.mxu0 %v277_v0  ;;  %264 = vmatprep.subr.mxu1 %v277_v0 }
   0xc   :  { %227 = vmatpush3.msra.mxu0 %v25_v6  ;;  %272 = vmatpush3.msra.mxu1 %v25_v6 }
   0xd   :  { %228 = vmatprep.subr.mxu0 %v277_v0  ;;  %265 = vmatprep.subr.mxu1 %v277_v0 }
   0xe   :  { %229 = vmatpush3.msra.mxu0 %v24_v7  ;;  %273 = vmatpush3.msra.mxu1 %v24_v7 }
   0xf   :  { %230 = vmatprep.subr.mxu0 %v277_v0  ;;  %232 = vmatprep.mubr.msk.f32.mxu0 %vm278_vm1, %v277_v0 }
  0x10   :  { %231 = vmatpush3.msra.mxu0 %v23_v8  ;;  %266 = vmatprep.subr.mxu1 %v277_v0 }
  0x11   :  { %233 = vmatmul.mubr.msk.f32.vlgmr.msra.gmra.mxu0 %vm38_vm0, %v14_v9  ;;  %274 = vmatpush3.msra.mxu1 %v23_v8 }
  0x12   :  { %247 = vmatprep.mubr.msk.f32.mxu1 %vm278_vm1, %v277_v0  ;;  %235 = vmatprep.mubr.msk.f32.mxu0 %vm278_vm1, %v277_v0 }
  0x13   :  { %248 = vmatmul.mubr.msk.f32.vlgmr.msra.gmra.mxu1 %vm38_vm0, %v19_v10 }
  0x14   :  { %250 = vmatprep.mubr.msk.f32.mxu1 %vm278_vm1, %v277_v0 }
  0x15   :  { %236 = vmatmul.mubr.msk.f32.gmra.mxu0 %vm38_vm0, %v15_v11 }
  0x16   :  { %238 = vmatprep.mubr.msk.f32.mxu0 %vm278_vm1, %v277_v0 }
  0x17   :  { %251 = vmatmul.mubr.msk.f32.gmra.mxu1 %vm38_vm0, %v20_v12 }
  0x18   :  { %253 = vmatprep.mubr.msk.f32.mxu1 %vm278_vm1, %v277_v0 }
  0x19   :  { %239 = vmatmul.mubr.msk.f32.gmra.mxu0 %vm38_vm0, %v16_v13 }
  0x1a   :  { %241 = vmatprep.mubr.msk.f32.mxu0 %vm278_vm1, %v277_v0 }
  0x1b   :  { %254 = vmatmul.mubr.msk.f32.gmra.mxu1 %vm38_vm0, %v21_v14 }
  0x1c   :  { %256 = vmatprep.mubr.msk.f32.mxu1 %vm278_vm1, %v277_v0 }
  0x1d   :  { %242 = vmatmul.mubr.msk.f32.gmra.mxu0 %vm38_vm0, %v17_v15 }
  0x1e   :  { %244 = vmatprep.mubr.msk.f32.mxu0 %vm278_vm1, %v277_v0 }
  0x1f   :  { %257 = vmatmul.mubr.msk.f32.gmra.mxu1 %vm38_vm0, %v22_v16 }
  0x21   :  { %245 = vmatmul.mubr.msk.f32.gmra.mxu0 %vm38_vm0, %v18_v17 }
  0xd1   :  { %v132_v19 = vpop.f32.mrf.mxu0 }
  0xd2   :  { %v133_v20 = vadd.f32 %v189_v18, %v132_v19 }
  0xd3   :  { %v234_v21 = vpop.f32.mrf.mxu0  ;;  %v157_v22 = vpop.f32.mrf.mxu1 }
  0xd4   :  { %176 = vst [vmem:[%s426_s3] sm:$0xff] %v133_v20  ;;  %v158_v23 = vadd.f32 %v189_v18, %v157_v22 }
  0xd5   :  { %v137_v24 = vpop.f32.mrf.mxu0  ;;  %v249_v25 = vpop.f32.mrf.mxu1 }
  0xd6   :  { %181 = vst [vmem:[%s426_s3 + $0x28] sm:$0xff] %v158_v23  ;;  %v138_v26 = vadd.f32 %v189_v18, %v137_v24 }
  0xd7   :  { %v237_v27 = vpop.f32.mrf.mxu0  ;;  %v162_v28 = vpop.f32.mrf.mxu1 }
  0xd8   :  { %177 = vst [vmem:[%s426_s3 + $0x8] sm:$0xff] %v138_v26  ;;  %v163_v29 = vadd.f32 %v189_v18, %v162_v28 }
  0xd9   :  { %v142_v30 = vpop.f32.mrf.mxu0  ;;  %v252_v31 = vpop.f32.mrf.mxu1 }
  0xda   :  { %182 = vst [vmem:[%s426_s3 + $0x30] sm:$0xff] %v163_v29  ;;  %v143_v32 = vadd.f32 %v189_v18, %v142_v30 }
  0xdb   :  { %v240_v33 = vpop.f32.mrf.mxu0  ;;  %v167_v34 = vpop.f32.mrf.mxu1 }
  0xdc   :  { %178 = vst [vmem:[%s426_s3 + $0x10] sm:$0xff] %v143_v32  ;;  %v168_v35 = vadd.f32 %v189_v18, %v167_v34 }
  0xdd   :  { %v147_v36 = vpop.f32.mrf.mxu0  ;;  %v255_v37 = vpop.f32.mrf.mxu1 }
  0xde   :  { %183 = vst [vmem:[%s426_s3 + $0x38] sm:$0xff] %v168_v35  ;;  %v148_v38 = vadd.f32 %v189_v18, %v147_v36 }
  0xdf   :  { %v243_v39 = vpop.f32.mrf.mxu0  ;;  %v172_v40 = vpop.f32.mrf.mxu1 }
  0xe0   :  { %179 = vst [vmem:[%s426_s3 + $0x18] sm:$0xff] %v148_v38  ;;  %v173_v41 = vadd.f32 %v189_v18, %v172_v40 }
  0xe1   :  { %v152_v42 = vpop.f32.mrf.mxu0  ;;  %v258_v43 = vpop.f32.mrf.mxu1 }
  0xe2   :  { %184 = vst [vmem:[%s426_s3 + $0x40] sm:$0xff] %v173_v41  ;;  %v153_v44 = vadd.f32 %v189_v18, %v152_v42 }
  0xe3   :  { %v246_v45 = vpop.f32.mrf.mxu0 }
  0xe4   :  { %180 = vst [vmem:[%s426_s3 + $0x20] sm:$0xff] %v153_v44 }

</bundles_post_ra>
